<compile_context>
chip_gen: v6e
topology: v6e:2x2x1
jax: 0.10.0
libtpu: 0.0.40
codegen_flags: <defaults>
</compile_context>

<pallas_src>
import functools

import jax
import jax.numpy as jnp
from jax.experimental import pallas as pl
from jax.experimental.pallas import tpu as pltpu


def gate_kernel(inv_s, x_ref, w1_ref, b1_ref, w2_ref, b2_ref, o_ref, acc_ref):
    # x_ref : (TB, TS, E)    w1_ref: (E, H)    b1_ref: (1, H)
    # w2_ref: (H, NE)        b2_ref: (1, NE)   o_ref : (TB, NE)
    # acc_ref: (TB, 1, E) f32 running sum over the S (sequence) axis.
    s = pl.program_id(1)

    @pl.when(s == 0)
    def _init():
        acc_ref[...] = jnp.zeros_like(acc_ref)

    # Hot loop: pure load + f32 accumulate.  keepdims=True keeps each TB row in its
    # own (1, E) slab, so no per-step sublane repack of the reduced result.
    acc_ref[...] += jnp.sum(x_ref[...], axis=1, keepdims=True, dtype=jnp.float32)

    @pl.when(s == pl.num_programs(1) - 1)
    def _epilogue():
        xm = acc_ref[:, 0, :] * inv_s                                 # (TB, E) mean over S
        h = jnp.dot(xm, w1_ref[...], preferred_element_type=jnp.float32)
        h = jnp.maximum(h + b1_ref[...], 0.0)                         # Linear + ReLU
        # Dropout(0.5): identity in eval mode.
        # TODO(synk): training-mode dropout would need pltpu.prng_seed/prng_random_bits.
        logits = jnp.dot(h, w2_ref[...], preferred_element_type=jnp.float32)
        logits = logits + b2_ref[...]                                 # (TB, NE)
        m = jnp.max(logits, axis=-1, keepdims=True)
        e = jnp.exp(logits - m)
        denom = jnp.sum(e, axis=-1, keepdims=True)
        o_ref[...] = e * pl.reciprocal(denom, approx=False)           # softmax(dim=1)


def _sublane_quantum(dtype):
    # Native sublane tiling: 8 for 32-bit, 16 for bf16, 32 for int8/fp8.
    bits = jnp.dtype(dtype).itemsize * 8
    return max(8, 256 // bits)


def _pick_tile(total, target, quantum):
    """Largest divisor of `total` that is <= target and a multiple of `quantum`,
    falling back to the full extent (full-extent blocks are always legal)."""
    best = None
    t = quantum
    limit = min(total, target)
    while t <= limit:
        if total % t == 0:
            best = t
        t += quantum
    return best if best is not None else total


def _chip_profile():
    """Per-generation X-tile budget (bytes per tile), VMEM limit, TensorCore count."""
    kind = ""
    try:
        kind = jax.devices()[0].device_kind.lower()
    except Exception:  # pragma: no cover - be robust to exotic backends
        pass
    if ("v5e" in kind) or ("v5 lite" in kind) or ("v5lite" in kind):
        # ~0.8 TB/s HBM: 4 MiB tiles already ~93% step-overhead-efficient; just
        # make sure we are above the 16 MiB default scoped limit.
        return {"x_tile_budget": 4 << 20, "vmem_limit": 64 << 20, "cores": 1}
    if "v6" in kind:
        # 1.4 TB/s HBM, 128 MiB VMEM: larger tiles cut the ~0.35us/step cost to a few %.
        return {"x_tile_budget": 12 << 20, "vmem_limit": 96 << 20, "cores": 1}
    if ("v7" in kind) or ("7x" in kind):
        # 3.2 TB/s HBM but only 64 MiB VMEM and 2 TensorCores per chip.
        return {"x_tile_budget": 14 << 20, "vmem_limit": 48 << 20, "cores": 2}
    if "v5" in kind:  # v5p: megacore, 128 MiB VMEM
        return {"x_tile_budget": 8 << 20, "vmem_limit": 96 << 20, "cores": 2}
    if "v4" in kind:
        return {"x_tile_budget": 8 << 20, "vmem_limit": 96 << 20, "cores": 2}
    # Unknown chip: conservative defaults.
    return {"x_tile_budget": 8 << 20, "vmem_limit": 48 << 20, "cores": 2}


def gate_forward(x, w1, b1, w2, b2, *, tb=None, ts=None):
    B, S, E = x.shape
    E_w, H = w1.shape
    NE = w2.shape[1]
    assert E_w == E

    prof = _chip_profile()
    itemsize = jnp.dtype(x.dtype).itemsize
    q_s = _sublane_quantum(x.dtype)   # sublane quantum for the S dim of the X tile
    q_b = 8                           # output block (tb, NE) is f32 -> sublane quantum 8

    # ---- VMEM accounting (X double-buffered, weights single-buffered, f32 acc) ----
    weight_bytes = (E * H + H + H * NE + NE) * 4
    acc_bytes_ub = min(B, 256) * E * 4
    out_bytes = 2 * min(B, 256) * NE * 4
    slack = 2 << 20
    avail_for_x = prof["vmem_limit"] - weight_bytes - acc_bytes_ub - out_bytes - slack
    x_tile_budget = max(q_b * q_s * E * itemsize,            # never below one minimal tile
                        min(prof["x_tile_budget"], avail_for_x // 2))

    if tb is None:
        tb_target = min(B, 256)
        # >=2 B tiles on 2-TensorCore chips so both cores stream the "parallel" axis.
        if prof["cores"] >= 2 and B >= 2 * q_b:
            tb_target = min(tb_target, max(q_b, (B // 2) // q_b * q_b))
        # Joint budget: even at the minimum ts, a single X tile must fit the budget.
        tb_cap = max(q_b, x_tile_budget // max(1, q_s * E * itemsize))
        tb = _pick_tile(B, min(tb_target, tb_cap), q_b)
    if ts is None:
        rows = x_tile_budget // max(1, tb * E * itemsize)
        ts = _pick_tile(S, max(q_s, rows), q_s)

    assert B % tb == 0 and S % ts == 0
    assert (tb % q_b == 0) or (tb == B)
    assert (ts % q_s == 0) or (ts == S)

    grid = (B // tb, S // ts)
    kernel = functools.partial(gate_kernel, 1.0 / S)

    cost = pl.CostEstimate(
        flops=2 * B * E * H + 2 * B * H * NE,
        transcendentals=B * NE,
        bytes_accessed=B * S * E * itemsize + weight_bytes + B * NE * 4,
    )

    return pl.pallas_call(
        kernel,
        out_shape=jax.ShapeDtypeStruct((B, NE), jnp.float32),
        grid=grid,
        in_specs=[
            # Streamed input tiles (double-buffered by the Pallas pipeline).
            pl.BlockSpec((tb, ts, E), lambda b, s: (b, s, 0)),
            # Weights / biases: constant index maps => VMEM-resident; single-buffered
            # since their block index never changes (no duplicate buffer).
            pl.BlockSpec((E, H), lambda b, s: (0, 0), pipeline_mode=pl.Buffered(1)),
            pl.BlockSpec((1, H), lambda b, s: (0, 0), pipeline_mode=pl.Buffered(1)),
            pl.BlockSpec((H, NE), lambda b, s: (0, 0), pipeline_mode=pl.Buffered(1)),
            pl.BlockSpec((1, NE), lambda b, s: (0, 0), pipeline_mode=pl.Buffered(1)),
        ],
        # Same output block across the S axis => accumulator-style residency.
        out_specs=pl.BlockSpec((tb, NE), lambda b, s: (b, 0)),
        scratch_shapes=[pltpu.VMEM((tb, 1, E), jnp.float32)],
        compiler_params=pltpu.CompilerParams(
            dimension_semantics=("parallel", "arbitrary"),
            vmem_limit_bytes=prof["vmem_limit"],
        ),
        cost_estimate=cost,
    )(x, w1, b1, w2, b2)


def gate_reference(x, w1, b1, w2, b2):
    xm = jnp.mean(x.astype(jnp.float32), axis=1)
    h = jnp.maximum(xm @ w1 + b1, 0.0)
    logits = h @ w2 + b2
    return jax.nn.softmax(logits, axis=-1)


def init_params(key, embed_dims, hidden=64, num_experts=4):
    k1, k2, k3, k4 = jax.random.split(key, 4)
    # Deterministic, torch-Linear-style uniform init (bound = 1/sqrt(fan_in)).
    bound1 = 1.0 / (embed_dims ** 0.5)
    bound2 = 1.0 / (hidden ** 0.5)
    w1 = jax.random.uniform(k1, (embed_dims, hidden), jnp.float32, -bound1, bound1)
    b1 = jax.random.uniform(k2, (1, hidden), jnp.float32, -bound1, bound1)
    w2 = jax.random.uniform(k3, (hidden, num_experts), jnp.float32, -bound2, bound2)
    b2 = jax.random.uniform(k4, (1, num_experts), jnp.float32, -bound2, bound2)
    return w1, b1, w2, b2


if __name__ == "__main__":
    B, S, E = 2, 16, 32
    num_experts = 4

    key = jax.random.PRNGKey(0)
    kx, kp = jax.random.split(key)
    x = jax.random.normal(kx, (B, S, E), jnp.float32)
    w1, b1, w2, b2 = init_params(kp, E, 64, num_experts)

    # ts=8 forces a 2-step S reduction so the accumulator/epilogue path is exercised.
    out = gate_forward(x, w1, b1, w2, b2, ts=8)
    out = jax.block_until_ready(out)

    ref = gate_reference(x, w1, b1, w2, b2)
    assert out.shape == (B, num_experts)
    assert jnp.allclose(jnp.sum(out, axis=-1), 1.0, atol=1e-5)
    assert jnp.allclose(out, ref, atol=1e-5, rtol=1e-5)

    # Also exercise the automatic tile picker (no explicit ts).
    out2 = jax.block_until_ready(gate_forward(x, w1, b1, w2, b2))
    assert jnp.allclose(out2, ref, atol=1e-5, rtol=1e-5)

    print("KERNEL_OK")
</pallas_src>

<mosaic_0001>
module attributes {stable_mosaic.version = 11 : i64} {
  func.func @gate_kernel(%arg0: i32, %arg1: i32, %arg2: memref<2x8x32xf32, #tpu.memory_space<vmem>>, %arg3: memref<32x64xf32, #tpu.memory_space<vmem>>, %arg4: memref<1x64xf32, #tpu.memory_space<vmem>>, %arg5: memref<64x4xf32, #tpu.memory_space<vmem>>, %arg6: memref<1x4xf32, #tpu.memory_space<vmem>>, %arg7: memref<2x4xf32, #tpu.memory_space<vmem>>, %arg8: memref<2x1x32xf32, #tpu.memory_space<vmem>>) attributes {dimension_semantics = [#tpu.dimension_semantics<parallel>, #tpu.dimension_semantics<arbitrary>], iteration_bounds = array<i64: 1, 2>, scalar_prefetch = 0 : i64, scratch_operands = 1 : i64, tpu.core_type = #tpu.core_type<tc>, window_params = [{transform_indices = @transform_0, window_bounds = array<i64: 2, 8, 32>}, {pipeline_mode = #tpu.pipeline_mode<synchronous>, transform_indices = @transform_1, window_bounds = array<i64: 32, 64>}, {pipeline_mode = #tpu.pipeline_mode<synchronous>, transform_indices = @transform_2, window_bounds = array<i64: 1, 64>}, {pipeline_mode = #tpu.pipeline_mode<synchronous>, transform_indices = @transform_3, window_bounds = array<i64: 64, 4>}, {pipeline_mode = #tpu.pipeline_mode<synchronous>, transform_indices = @transform_4, window_bounds = array<i64: 1, 4>}, {transform_indices = @transform_5, window_bounds = array<i64: 2, 4>}]} {
    %c0_i32 = arith.constant 0 : i32
    %0 = arith.cmpi eq, %arg1, %c0_i32 : i32
    %1 = arith.extui %0 : i1 to i32
    %c0_i32_0 = arith.constant 0 : i32
    %2 = arith.cmpi ne, %1, %c0_i32_0 : i32
    scf.if %2 {
      %cst_10 = arith.constant 0.000000e+00 : f32
      %12 = vector.broadcast %cst_10 : f32 to vector<2x1x32xf32>
      %c0_11 = arith.constant 0 : index
      %c0_12 = arith.constant 0 : index
      %c0_13 = arith.constant 0 : index
      %13 = vector.load %arg8[%c0_11, %c0_12, %c0_13] : memref<2x1x32xf32, #tpu.memory_space<vmem>>, vector<2x1x32xf32>
      tpu.vector_store %arg8[%c0_11, %c0_12, %c0_13], %12 {strides = array<i32>} : memref<2x1x32xf32, #tpu.memory_space<vmem>>, vector<2x1x32xf32>,
    } else {
    }
    %c0 = arith.constant 0 : index
    %c0_1 = arith.constant 0 : index
    %c0_2 = arith.constant 0 : index
    %3 = vector.load %arg8[%c0, %c0_1, %c0_2] : memref<2x1x32xf32, #tpu.memory_space<vmem>>, vector<2x1x32xf32>
    %c0_3 = arith.constant 0 : index
    %c0_4 = arith.constant 0 : index
    %c0_5 = arith.constant 0 : index
    %4 = vector.load %arg2[%c0_3, %c0_4, %c0_5] : memref<2x8x32xf32, #tpu.memory_space<vmem>>, vector<2x8x32xf32>
    %cst = arith.constant dense<0.000000e+00> : vector<2x32xf32>
    %5 = vector.multi_reduction <add>, %4, %cst [1] : vector<2x8x32xf32> to vector<2x32xf32>
    %6 = vector.shape_cast %5 : vector<2x32xf32> to vector<2x1x32xf32>
    %7 = arith.addf %3, %6 : vector<2x1x32xf32>
    %c0_6 = arith.constant 0 : index
    %c0_7 = arith.constant 0 : index
    %c0_8 = arith.constant 0 : index
    %8 = vector.load %arg8[%c0_6, %c0_7, %c0_8] : memref<2x1x32xf32, #tpu.memory_space<vmem>>, vector<2x1x32xf32>
    tpu.vector_store %arg8[%c0_6, %c0_7, %c0_8], %7 {strides = array<i32>} : memref<2x1x32xf32, #tpu.memory_space<vmem>>, vector<2x1x32xf32>,
    %c1_i32 = arith.constant 1 : i32
    %9 = arith.cmpi eq, %arg1, %c1_i32 : i32
    %10 = arith.extui %9 : i1 to i32
    %c0_i32_9 = arith.constant 0 : i32
    %11 = arith.cmpi ne, %10, %c0_i32_9 : i32
    scf.if %11 {
      %c0_10 = arith.constant 0 : index
      %c0_11 = arith.constant 0 : index
      %c0_12 = arith.constant 0 : index
      %12 = vector.load %arg8[%c0_10, %c0_11, %c0_12] : memref<2x1x32xf32, #tpu.memory_space<vmem>>, vector<2x1x32xf32>
      %13 = vector.shape_cast %12 : vector<2x1x32xf32> to vector<2x32xf32>
      %cst_13 = arith.constant 6.250000e-02 : f32
      %14 = vector.broadcast %cst_13 : f32 to vector<2x32xf32>
      %15 = arith.mulf %13, %14 : vector<2x32xf32>
      %c0_14 = arith.constant 0 : index
      %c0_15 = arith.constant 0 : index
      %16 = vector.load %arg3[%c0_14, %c0_15] : memref<32x64xf32, #tpu.memory_space<vmem>>, vector<32x64xf32>
      %cst_16 = arith.constant dense<0.000000e+00> : vector<2x64xf32>
      %17 = tpu.matmul %15, %16, %cst_16 {dimension_numbers = #tpu.dot_dimension_numbers<[1], [0], [0], [1], [0, 0, 1, 1], [], []>} : vector<2x32xf32>, vector<32x64xf32>, vector<2x64xf32> -> vector<2x64xf32>
      %c0_17 = arith.constant 0 : index
      %c0_18 = arith.constant 0 : index
      %18 = vector.load %arg4[%c0_17, %c0_18] : memref<1x64xf32, #tpu.memory_space<vmem>>, vector<1x64xf32>
      %19 = vector.broadcast %18 : vector<1x64xf32> to vector<2x64xf32>
      %20 = arith.addf %17, %19 : vector<2x64xf32>
      %cst_19 = arith.constant 0.000000e+00 : f32
      %21 = vector.broadcast %cst_19 : f32 to vector<2x64xf32>
      %22 = arith.maximumf %20, %21 : vector<2x64xf32>
      %c0_20 = arith.constant 0 : index
      %c0_21 = arith.constant 0 : index
      %23 = vector.load %arg5[%c0_20, %c0_21] : memref<64x4xf32, #tpu.memory_space<vmem>>, vector<64x4xf32>
      %cst_22 = arith.constant dense<0.000000e+00> : vector<2x4xf32>
      %24 = tpu.matmul %22, %23, %cst_22 {dimension_numbers = #tpu.dot_dimension_numbers<[1], [0], [0], [1], [0, 0, 1, 1], [], []>} : vector<2x64xf32>, vector<64x4xf32>, vector<2x4xf32> -> vector<2x4xf32>
      %c0_23 = arith.constant 0 : index
      %c0_24 = arith.constant 0 : index
      %25 = vector.load %arg6[%c0_23, %c0_24] : memref<1x4xf32, #tpu.memory_space<vmem>>, vector<1x4xf32>
      %26 = vector.broadcast %25 : vector<1x4xf32> to vector<2x4xf32>
      %27 = arith.addf %24, %26 : vector<2x4xf32>
      %cst_25 = arith.constant dense<0xFF800000> : vector<2xf32>
      %28 = vector.multi_reduction <maximumf>, %27, %cst_25 [1] : vector<2x4xf32> to vector<2xf32>
      %29 = vector.shape_cast %28 : vector<2xf32> to vector<2x1xf32>
      %30 = vector.broadcast %29 : vector<2x1xf32> to vector<2x4xf32>
      %31 = arith.subf %27, %30 : vector<2x4xf32>
      %32 = math.exp %31 : vector<2x4xf32>
      %cst_26 = arith.constant dense<0.000000e+00> : vector<2xf32>
      %33 = vector.multi_reduction <add>, %32, %cst_26 [1] : vector<2x4xf32> to vector<2xf32>
      %34 = vector.shape_cast %33 : vector<2xf32> to vector<2x1xf32>
      %35 = tpu.reciprocal %34 : vector<2x1xf32> -> vector<2x1xf32>
      %36 = vector.broadcast %35 : vector<2x1xf32> to vector<2x4xf32>
      %37 = arith.mulf %32, %36 : vector<2x4xf32>
      %c0_27 = arith.constant 0 : index
      %c0_28 = arith.constant 0 : index
      %38 = vector.load %arg7[%c0_27, %c0_28] : memref<2x4xf32, #tpu.memory_space<vmem>>, vector<2x4xf32>
      tpu.vector_store %arg7[%c0_27, %c0_28], %37 {strides = array<i32>} : memref<2x4xf32, #tpu.memory_space<vmem>>, vector<2x4xf32>,
    } else {
    }
    return
  }
  func.func @transform_0(%arg0: i32, %arg1: i32) -> (i32, i32, i32) {
    %c0_i32 = arith.constant 0 : i32
    %c0_i32_0 = arith.constant 0 : i32
    return %arg0, %arg1, %c0_i32 : i32, i32, i32
  }
  func.func @transform_1(%arg0: i32, %arg1: i32) -> (i32, i32) {
    %c0_i32 = arith.constant 0 : i32
    %c0_i32_0 = arith.constant 0 : i32
    %c0_i32_1 = arith.constant 0 : i32
    return %c0_i32, %c0_i32_0 : i32, i32
  }
  func.func @transform_2(%arg0: i32, %arg1: i32) -> (i32, i32) {
    %c0_i32 = arith.constant 0 : i32
    %c0_i32_0 = arith.constant 0 : i32
    %c0_i32_1 = arith.constant 0 : i32
    return %c0_i32, %c0_i32_0 : i32, i32
  }
  func.func @transform_3(%arg0: i32, %arg1: i32) -> (i32, i32) {
    %c0_i32 = arith.constant 0 : i32
    %c0_i32_0 = arith.constant 0 : i32
    %c0_i32_1 = arith.constant 0 : i32
    return %c0_i32, %c0_i32_0 : i32, i32
  }
  func.func @transform_4(%arg0: i32, %arg1: i32) -> (i32, i32) {
    %c0_i32 = arith.constant 0 : i32
    %c0_i32_0 = arith.constant 0 : i32
    %c0_i32_1 = arith.constant 0 : i32
    return %c0_i32, %c0_i32_0 : i32, i32
  }
  func.func @transform_5(%arg0: i32, %arg1: i32) -> (i32, i32) {
    %c0_i32 = arith.constant 0 : i32
    %c0_i32_0 = arith.constant 0 : i32
    return %arg0, %c0_i32 : i32, i32
  }
}

</mosaic_0001>

<bundles_post_ra>
// kernel: tpu_custom_call.1
= control target key start
LH: loop header
LB: loop body
LE: loop exit
PB: predicated region body
PF: predicated region fallthrough
CT: control target
= control target key end

     0   :  { %10 = vsyncpa [#allocation5], 0  ;;  %s801_s18 = smov 0   ;;  %s803_s19 = smov 0   ;;  %s932_s0 = inlined_call_operand.vmem [shape: f32[2,16,32], index: 0, kind: input, shape index: {}]   ;;  %s933_s1 = inlined_call_operand.vmem [shape: f32[32,64], index: 1, kind: input, shape index: {}]   ;;  %s934_s2 = inlined_call_operand.vmem [shape: f32[1,64], index: 2, kind: input, shape index: {}]   ;;  %s935_s3 = inlined_call_operand.vmem [shape: f32[64,4], index: 3, kind: input, shape index: {}]   ;;  %s936_s4 = inlined_call_operand.vmem [shape: f32[1,4], index: 4, kind: input, shape index: {}]   ;;  %s937_s5 = inlined_call_operand.hbm [shape: f32[2,4], index: 5, kind: output, shape index: {}]  }
   0x1   :  { %s805_s20 = smov 0   ;;  %s807_s21 = smov 0  }
   0x2   :  { %s809_s22 = smov 0  }
   0x3 LB: > { %s582_s23 = sadd.s32 4294967295, %s764_s22   ;;  %s25_s24 = sadd.s32 1, %s760_s21  ;;  %s764_s22 = sphi %s809_s22, %s16_s22   ;;  %s760_s21 = sphi %s807_s21, %s942_s21   ;;  %s756_s20 = sphi %s805_s20, %s941_s20   ;;  %s752_s19 = sphi %s803_s19, %s940_s19   ;;  %s748_s18 = sphi %s801_s18, %s939_s18  }
   0x4   : > { %p26_p0 = scmp.ge.s32.totalorder %s25_s24, 2  ;;  %p44_p1 = scmp.ne.s32.totalorder %s752_s19, %s748_s18 }
   0x5   : > { %p45_p2 = scmp.eq.s32.totalorder %s764_s22, 0  ;;  %s37_s26 = sadd.s32 1, %s752_s19 }
   0x6   : > { %s944_s24 = smov (%p26_p0, %s25_s24), 0  ;;  %p584_p5 = scmp.ge.s32.totalorder %s764_s22, 2 }
   0x7   : > { %p46_p3 = por %p45_p2, %p44_p1  ;;  %s33_s25 = ssub.s32 %s760_s21, %s944_s24 }
   0x8   : > { %p35_p4 = scmp.eq.s32.totalorder %s33_s25, 0  ;;  %192 = sbr.rel (%p584_p5) target bundleno = 18 (0x12), region = 32 }
   0xa   : > { %s837_s27 = scalar_select %p35_p4, %s752_s19, %s37_s26  }
   0xd   : > { %195 = sbr.rel (!%p46_p3) target bundleno = 18 (0x12), region = 36  ;;  %s197_s28 = sand.u32 (%p46_p3), 1, %s752_s19  }
   0xe   : > { %s586_s29 = sshll.u32 (%p46_p3), %s760_s21, 3  ;;  %s585_s30 = sshll.u32 (%p46_p3), %s197_s28, 4 }
   0xf   : > { %s204_s8 = scalar_lea.vmem (%p46_p3), %s932_s0, %s586_s29  ;;  %s199_s9 = scalar_lea.vmem (%p46_p3), [#allocation3], %s585_s30 }
  0x10   : > { %v235_v0 = vld [vmem:[%s204_s8] sm:$0xff] (%p46_p3)  ;;  %v237_v1 = vld [vmem:[%s204_s8 + $0x10] sm:$0xff] (%p46_p3) }
  0x11   : > { %236 = vst [vmem:[%s199_s9] sm:$0xff] (%p46_p3), %v235_v0  ;;  %238 = vst [vmem:[%s199_s9 + $0x8] sm:$0xff] (%p46_p3), %v237_v1 }
  0x12 PF: > { %p587_p6 = scmp.ge.s32.totalorder %s764_s22, 1  ;;  %p243_p7 = scmp.lt.s32.totalorder %s764_s22, 3 }
  0x14   : > { %p244_p8 = pnand %p587_p6, %p243_p7 }
  0x15   : > { %s250_s10 = sand.u32 (!%p244_p8), 1, %s748_s18   ;;  %p589_p9 = scmp.ne.s32.totalorder (!%p244_p8), %s756_s20, 0 }
  0x16   : > { %247 = sbr.rel (%p244_p8) target bundleno = 786 (0x312), region = 74  ;;  %s588_s11 = sshll.u32 (!%p244_p8), %s250_s10, 4 }
  0x17   : > { %s252_s12 = scalar_lea.vmem (!%p244_p8), [#allocation3], %s588_s11 }
  0x1b   : > { %276 = sbr.rel (%p589_p9) target bundleno = 34 (0x22), region = 82 }
  0x20   : > { %vm277_vm0 = vcmask 253952   ;;  %v766_v2 = vmov 0.0  }
  0x21   : > { %278 = vst.msk [vmem:[#allocation2] sm:$0x1] %vm277_vm0, %v766_v2  ;;  %279 = vst.msk [vmem:[#allocation2 + $0x1] sm:$0x1] %vm277_vm0, %v766_v2 }
  0x22 PF: > { %v282_v3 = vld [vmem:[%s252_s12] sm:$0xff]  ;;  %vm284_vm1 = vcmask 261120   ;;  %v283_v4 = vld [vmem:[%s252_s12 + $0x8] sm:$0xff]  ;;  %vm301_vm2 = vcmask 253952   ;;  %p590_p10 = scmp.ne.s32.totalorder %s756_s20, 1 }
  0x23   : > { %v285_v5 = vsel %vm284_vm1, %v282_v3, 0.0  ;;  %v292_v6 = vsel %vm284_vm1, %v283_v4, 0.0 }
  0x24   : > { %v286_v7 = vrot.slane %v285_v5, 4  ;;  %v293_v8 = vrot.slane %v292_v6, 4 }
  0x26   : > { %v287_v9 = vadd.f32 %v286_v7, %v285_v5  ;;  %v294_v10 = vadd.f32 %v293_v8, %v292_v6 }
  0x28   : > { %v288_v11 = vrot.slane %v287_v9, 2  ;;  %v295_v12 = vrot.slane %v294_v10, 2  ;;  %v280_v17 = vld [vmem:[#allocation2] sm:$0x1]  ;;  %v281_v18 = vld [vmem:[#allocation2 + $0x1] sm:$0x1] }
  0x2a   : > { %v289_v13 = vadd.f32 %v288_v11, %v287_v9  ;;  %v296_v14 = vadd.f32 %v295_v12, %v294_v10 }
  0x2c   : > { %v290_v15 = vrot.slane %v289_v13, 1  ;;  %v297_v16 = vrot.slane %v296_v14, 1 }
  0x2e   : > { %v291_v19 = vadd.f32 %v290_v15, %v289_v13  ;;  %v298_v20 = vadd.f32 %v297_v16, %v296_v14  ;;  %307 = sbr.rel (%p590_p10) target bundleno = 771 (0x303), region = 86 }
  0x30   : > { %v299_v21 = vadd.f32 %v291_v19, %v280_v17  ;;  %v300_v22 = vadd.f32 %v298_v20, %v281_v18 }
  0x32   : > { %302 = vst.msk [vmem:[#allocation2] sm:$0x1] %vm301_vm2, %v299_v21  ;;  %303 = vst.msk [vmem:[#allocation2 + $0x1] sm:$0x1] %vm301_vm2, %v300_v22 }
  0x33   : > { %v315_v23 = vld [vmem:[%s933_s1 + $0x18] sm:$0xff]  ;;  %v329_v24 = vlaneseq  ;;  %v767_v25 = vmov 0.0   ;;  %v314_v26 = vld [vmem:[%s933_s1 + $0x10] sm:$0xff]  ;;  %vm768_vm3 = vmmov 0   ;;  %v313_v32 = vld [vmem:[%s933_s1 + $0x8] sm:$0xff]  ;;  %vm428_vm4 = vcmask 523264  }
  0x34   : > { %613 = vmatprep.subr.mxu0 %v767_v25  ;;  %621 = vmatprep.mubr.msk.f32.mxu0 %vm768_vm3, %v767_v25  ;;  %v420_v31 = vld [vmem:[%s935_s3 + $0x38] sm:$0xff]  ;;  %v769_v33 = vmov 1966171168   ;;  %v419_v36 = vld [vmem:[%s935_s3 + $0x30] sm:$0xff]  ;;  %v418_v37 = vld [vmem:[%s935_s3 + $0x28] sm:$0xff]  ;;  %vm502_vm5 = vcmask 25600  }
  0x35   : > { %614 = vmatpush3.msra.mxu0 %v315_v23  ;;  %624 = vmatprep.subr.mxu1 %v767_v25  ;;  %v327_v34 = vunpack.c.l.s4 %v769_v33  ;;  %v330_v35 = vshrl.u32 %v329_v24, 7  ;;  %v312_v38 = vld [vmem:[%s933_s1] sm:$0xff]  ;;  %v416_v43 = vld [vmem:[%s935_s3 + $0x18] sm:$0xff]  ;;  %v415_v46 = vld [vmem:[%s935_s3 + $0x10] sm:$0xff] }
  0x36   : > { %615 = vmatprep.subr.mxu0 %v767_v25  ;;  %625 = vmatpush3.msra.mxu1 %v420_v31  ;;  %v417_v41 = vld [vmem:[%s935_s3 + $0x20] sm:$0xff]  ;;  %v414_v47 = vld [vmem:[%s935_s3 + $0x8] sm:$0xff] }
  0x37   : > { %616 = vmatpush3.msra.mxu0 %v314_v26  ;;  %626 = vmatprep.subr.mxu1 %v767_v25  ;;  %v328_v40 = vunpack.c.0.s8 %v327_v34  ;;  %v413_v48 = vld [vmem:[%s935_s3] sm:$0xff] }
  0x38   : > { %617 = vmatprep.subr.mxu0 %v767_v25  ;;  %627 = vmatpush3.msra.mxu1 %v419_v36  ;;  %v591_v49 = vld [vmem:[%s934_s2] ss:$0 sm:$0xff] }
  0x39   : > { %v308_v27 = vld [vmem:[#allocation2] sm:$0x1]  ;;  %v309_v28 = vld [vmem:[#allocation2 + $0x1] sm:$0x1]  ;;  %618 = vmatpush3.msra.mxu0 %v313_v32  ;;  %628 = vmatprep.subr.mxu1 %v767_v25  ;;  %v331_v42 = vsub.s32 %v328_v40, %v330_v35 }
  0x3a   : > { %v310_v29 = vmul.f32 0.0625, %v308_v27  ;;  %v311_v30 = vmul.f32 0.0625, %v309_v28  ;;  %619 = vmatprep.subr.mxu0 %v767_v25  ;;  %629 = vmatpush3.msra.mxu1 %v418_v37  ;;  %v593_v54 = vld [vmem:[%s936_s4] ss:$0 sm:$0xff] }
  0x3b   : > { %620 = vmatpush3.msra.mxu0 %v312_v38  ;;  %630 = vmatprep.subr.mxu1 %v767_v25 }
  0x3c   : > { %v325_v39 = vcombine.low %v310_v29, %v311_v30  ;;  %631 = vmatpush3.msra.mxu1 %v417_v41  ;;  %640 = vmatprep.mubr.msk.f32.mxu1 %vm768_vm3, %v767_v25 }
  0x3d   : > { %632 = vmatprep.subr.mxu1 %v767_v25 }
  0x3e   : > { %v332_v44 = vrot.slane %v325_v39, %v331_v42  ;;  %633 = vmatpush3.msra.mxu1 %v416_v43 }
  0x3f   : > { %634 = vmatprep.subr.mxu1 %v767_v25 }
  0x40   : > { %v339_v45 = vrot.slane %v332_v44, %v331_v42  ;;  %635 = vmatpush3.msra.mxu1 %v415_v46 }
  0x41   : > { %636 = vmatprep.subr.mxu1 %v767_v25 }
  0x42   : > { %622 = vmatmul.mubr.msk.f32.vlgmr.msra.gmra.mxu0 %vm284_vm1, %v339_v45  ;;  %637 = vmatpush3.msra.mxu1 %v414_v47 }
  0x43   : > { %638 = vmatprep.subr.mxu1 %v767_v25 }
  0x44   : > { %639 = vmatpush3.msra.mxu1 %v413_v48 }
 0x102   : > { %v408_v50 = vpop.f32.mrf.mxu0 }
 0x103   : > { %v409_v51 = vadd.f32 %v591_v49, %v408_v50 }
 0x104   : > { %v623_v52 = vpop.f32.mrf.mxu0 }
 0x105   : > { %v412_v53 = vmax.f32 %v409_v51, 0.0 }
 0x107   : > { %641 = vmatmul.mubr.msk.f32.vlgmr.msra.gmra.mxu1 %vm428_vm4, %v412_v53 }
 0x1c7   : > { %v498_v55 = vpop.f32.mrf.mxu1 }
 0x1c8   : > { %v499_v56 = vadd.f32 %v593_v54, %v498_v55 }
 0x1c9   : > { %v642_v57 = vpop.f32.mrf.mxu1 }
 0x1ca   : > { %v503_v58 = vsel %vm502_vm5, %v499_v56, -inf }
 0x1cb   : > { %504 = vmax.xlane.f32.xlu0 %v503_v58 }
 0x254   : > { %v505_v59 = vpop.xlane.xlu0 %504 }
 0x255   : > { %v506_v60 = vsub.f32 %v499_v56, %v505_v59 }
 0x257   : > { %v507_v61 = vmul.f32 1.442695, %v506_v60 }
 0x259   : > { %694 = vpow2.f32 %v507_v61 }
 0x266   : > { %v695_v62 = vpop.eup %694 }
 0x267   : > { %v509_v63 = vsel %vm502_vm5, %v695_v62, 0.0 }
 0x268   : > { %510 = vadd.xlane.f32.xlu0 %v509_v63 }
 0x2f1   : > { %v511_v0 = vpop.xlane.xlu0 %510 }
 0x2f2   : > { %696 = vrcp.f32 %v511_v0 }
 0x2ff   : > { %v697_v1 = vpop.eup %696 }
 0x300   : > { %v513_v2 = vmul.f32 %v697_v1, %v695_v62 }
 0x302   : > { %514 = vst.msk [vmem:[#allocation4] sm:$0x3] %vm502_vm5, %v513_v2 }
 0x303 PF: > { %p902_p11 = scmp.eq.s32.totalorder %s582_s23, 1  ;;  %s770_s29 = smov [#allocation4]  }
 0x304   : > { %s524_s30 = sshll.u32 %s770_s29, 4  ;;  %s525_s30 = int_to_ptr.vmem [resolvable:$true] %s524_s30 }
 0x305   : > { %s698_s6 = scalar_lea.vmem %s525_s30, 32  ;;  %p705_p1 = scmp.lt.s32.totalorder %s525_s30, %s525_s30 }
 0x306   : > { %p699_p12 = scmp.ne.s32.totalorder %s525_s30, %s698_s6  ;;  %p706_p2 = scmp.lt.s32.totalorder %s698_s6, %s698_s6 }
 0x308   : > { %p700_p13 = pnand %p699_p12, %p902_p11  ;;  %p707_p3 = por %p706_p2, %p705_p1 }
 0x30a   : > { %p701_p0 = pneg %p700_p13 }
 0x30c   : > { %p708_p4 = pnand %p707_p3, %p701_p0 }
 0x30e   : > { %711 = shalt.err (!%p708_p4)
}
 0x30f   : > { %644 = dma.vmem_to_hbm [thread:$0]  (%p902_p11), %s525_s30, 32, %s937_s5, [#allocation5]  }
 0x310   : > { %743 = dma.done.wait (%p902_p11), [#allocation5], 32  }
 0x311   : > { %745 = vsyncadd (%p902_p11), [#allocation5], 4294967264 }
 0x312 PF: > { %s16_s22 = sadd.s32 1, %s764_s22   ;;  %s939_s18 = smov %s752_s19 }
 0x313   : > { %p13_p5 = scmp.ge.s32.totalorder %s16_s22, 4   ;;  %s940_s19 = smov %s837_s27 }
 0x314   : > { %s941_s20 = smov %s760_s21  ;;  %s942_s21 = smov %s944_s24 }
 0x315   :  { %15 = sbr.rel (!%p13_p5) target bundleno = 3 (0x3), region = 119 }
 0x31a   :  { %537 = vsyncpa [#allocation5], 1 }
 0x31b   :  { %539 = vsyncpa [#allocation5 + $0x1], 1 }

</bundles_post_ra>
